<compile_context>
chip_gen: v6e
topology: v6e:2x2x1
jax: 0.10.0
libtpu: 0.0.40
codegen_flags: <defaults>
</compile_context>

<pallas_src>
import functools
import math

import jax
import jax.numpy as jnp
from jax import lax
from jax.experimental import pallas as pl
from jax.experimental.pallas import tpu as pltpu


def _backbone_update_kernel(s_ref, w_ref, b_ref, o_ref):
    # s_ref: (tile_m, c_s)   w_ref: (update_dim, c_s)   b_ref: (1, update_dim)
    # o_ref: (tile_m, update_dim)
    acc = lax.dot_general(
        s_ref[...], w_ref[...],
        dimension_numbers=(((1,), (1,)), ((), ())),   # contract both last dims
        preferred_element_type=jnp.float32,
    )
    o_ref[...] = (acc + b_ref[...]).astype(o_ref.dtype)


def _tensorcores_per_device():
    """Best-effort count of TensorCores behind one JAX device (megacore chips
    such as v4 / v7x expose 2; v5e / v6e expose 1)."""
    try:
        dev = jax.devices()[0]
    except Exception:
        return 1
    if getattr(dev, "platform", "") != "tpu":
        return 1
    for attr in ("num_cores", "core_count", "num_tensor_cores"):
        n = getattr(dev, attr, None)
        if isinstance(n, int) and n >= 1:
            return n
    kind = (getattr(dev, "device_kind", "") or "").lower()
    if "v4" in kind or "v7" in kind:
        return 2
    return 1


def _round_down_128(x):
    return max(128, (x // 128) * 128)


def _round_up_128(x):
    return max(128, ((x + 127) // 128) * 128)


def _pick_tile_m(m, c_s, itemsize, tile_m_max, num_cores):
    """Rows per block.

    Single-TC: biggest block that fits a ~4 MiB budget (grid of 1-2 steps).
    Multi-TC:  >= num_cores blocks when m >= 512 (keep every core streaming),
               preferring 2 blocks/core but never below ~1.5 MiB / 256 rows
               per block so per-step overhead stays a small fraction.
    """
    bytes_per_row = max(1, c_s * itemsize)
    # ~4 MiB per input block: double-buffered that is 8 MiB, far below every
    # generation's scoped-VMEM default (16 MiB v5e, 32 MiB v6e/v7x).
    budget_rows = _round_down_128((4 * 1024 * 1024) // bytes_per_row)
    tile = min(tile_m_max, budget_rows)

    if num_cores > 1 and m >= 512:
        per_core = _round_up_128(-(-m // num_cores))            # >= 1 block/core
        ideal = _round_up_128(-(-m // (2 * num_cores)))         # 2 blocks/core
        floor = max(256, _round_down_128((3 * 1024 * 1024 // 2) // bytes_per_row))
        # Bytes floor wins over extra splitting, but never leave a core idle.
        tile = min(tile, min(per_core, max(ideal, floor)))

    if m <= tile:
        # Single block: block dims equal the full array dims, so no (8,128)
        # divisibility requirement and no padding needed (works for any dtype).
        return m
    return tile


def _make_s_spec(tile_m, c_s, extra_buffering):
    if extra_buffering:
        try:
            # Deeper input pipelining when blocks are small (v7x dual-TC split):
            # hides step-boundary DMA issue bubbles of a near-zero-compute body.
            return pl.BlockSpec((tile_m, c_s), lambda i: (i, 0),
                                pipeline_mode=pl.Buffered(3))
        except TypeError:
            pass  # older BlockSpec without pipeline_mode: default double-buffer
    return pl.BlockSpec((tile_m, c_s), lambda i: (i, 0))


@functools.partial(
    jax.jit, static_argnames=("tile_m_max", "min_pallas_bytes", "num_cores"))
def backbone_update(s, weight, bias, *, tile_m_max=2048,
                    min_pallas_bytes=256 * 1024, num_cores=None):
    """Pallas BackboneUpdate forward.

    Args:
      s:      [..., N_res, c_s] single representation.
      weight: [update_dim, c_s]  (torch nn.Linear weight layout).
      bias:   [update_dim].
    Returns:
      [..., N_res, update_dim] update vector (dtype of s).
    """
    *lead, c_s = s.shape
    update_dim, c_s_w = weight.shape
    assert c_s_w == c_s, (c_s_w, c_s)

    m = math.prod(lead) if lead else 1
    s2d = s.reshape(m, c_s)
    # NOTE: when s is bf16 and weight is f32 this demotes the weight to bf16
    # (f32 accumulation is kept via preferred_element_type); small, documented
    # deviation from fp32-weight torch math.
    w = weight.astype(s.dtype)
    b2d = bias.astype(jnp.float32).reshape(1, update_dim)

    in_bytes = m * c_s * s.dtype.itemsize
    if in_bytes < min_pallas_bytes:
        # Tiny problem: fixed pallas_call / pipeline overhead dominates; let
        # XLA's fused linear handle it.
        out2d = jnp.dot(s2d, w.T, preferred_element_type=jnp.float32)
        out2d = (out2d + b2d).astype(s.dtype)
        return out2d.reshape(*lead, update_dim)

    if num_cores is None:
        num_cores = _tensorcores_per_device()

    tile_m = _pick_tile_m(m, c_s, s.dtype.itemsize, tile_m_max, num_cores)
    grid_steps = pl.cdiv(m, tile_m)   # partial last block is masked by Pallas
    tile_bytes = tile_m * c_s * s.dtype.itemsize
    extra_buffering = (grid_steps >= 4) and (tile_bytes <= 2 * 1024 * 1024)

    cost = pl.CostEstimate(
        flops=2 * m * c_s * update_dim,
        transcendentals=0,
        bytes_accessed=(m * c_s * s.dtype.itemsize
                        + m * update_dim * s.dtype.itemsize
                        + update_dim * c_s * w.dtype.itemsize
                        + update_dim * 4),
    )

    out2d = pl.pallas_call(
        _backbone_update_kernel,
        out_shape=jax.ShapeDtypeStruct((m, update_dim), s.dtype),
        grid_spec=pltpu.PrefetchScalarGridSpec(
            num_scalar_prefetch=0,
            grid=(grid_steps,),
            in_specs=[
                _make_s_spec(tile_m, c_s, extra_buffering),
                pl.BlockSpec((update_dim, c_s), lambda i: (0, 0)),  # resident
                pl.BlockSpec((1, update_dim), lambda i: (0, 0)),    # resident
            ],
            out_specs=pl.BlockSpec((tile_m, update_dim), lambda i: (i, 0)),
        ),
        compiler_params=pltpu.CompilerParams(
            dimension_semantics=("parallel",)),
        cost_estimate=cost,
    )(s2d, w, b2d)

    return out2d.reshape(*lead, update_dim)


def init_backbone_update_params(key, c_s, use_rot_updates):
    """Deterministic synthetic params (torch Linear layout: W [out, in], b [out])."""
    update_dim = 6 if use_rot_updates else 3
    kw, kb = jax.random.split(key)
    w = jax.random.normal(kw, (update_dim, c_s), jnp.float32) * 0.02
    b = jax.random.normal(kb, (update_dim,), jnp.float32) * 0.02
    return w, b


def _reference(s, w, b):
    return jnp.einsum("...nc,dc->...nd", s, w) + b


if __name__ == "__main__":
    key = jax.random.PRNGKey(0)
    k_params, k_s_small, k_s_large = jax.random.split(key, 3)

    use_rot_updates = True  # update_dim = 6

    # --- Small shape (module-typical toy size). Force the Pallas path so the
    # kernel itself is exercised even below the XLA-fallback threshold.
    batch, n_res, c_s = 2, 8, 32
    w, b = init_backbone_update_params(k_params, c_s, use_rot_updates)
    s_small = jax.random.normal(k_s_small, (batch, n_res, c_s), jnp.float32)

    out_small = backbone_update(s_small, w, b, min_pallas_bytes=0)
    out_small = jax.block_until_ready(out_small)
    ref_small = _reference(s_small, w, b)
    assert out_small.shape == (batch, n_res, 6), out_small.shape
    assert jnp.allclose(out_small, ref_small, atol=1e-5, rtol=1e-5), \
        "small-shape mismatch vs reference"

    # --- Larger shape: exercises the tiled / multi-step grid policy
    # (and the plain-XLA fallback threshold logic with default settings).
    batch_l, n_res_l, c_s_l = 2, 1024, 128
    w_l, b_l = init_backbone_update_params(k_params, c_s_l, use_rot_updates)
    s_large = jax.random.normal(k_s_large, (batch_l, n_res_l, c_s_l), jnp.float32)

    out_large = backbone_update(s_large, w_l, b_l)
    out_large = jax.block_until_ready(out_large)
    ref_large = _reference(s_large, w_l, b_l)
    assert out_large.shape == (batch_l, n_res_l, 6), out_large.shape
    assert jnp.allclose(out_large, ref_large, atol=1e-4, rtol=1e-4), \
        "large-shape mismatch vs reference"

    print("KERNEL_OK")
</pallas_src>

<mosaic_0001>
module attributes {stable_mosaic.version = 11 : i64} {
  func.func @_backbone_update_kernel(%arg0: i32, %arg1: memref<16x32xf32, #tpu.memory_space<vmem>>, %arg2: memref<6x32xf32, #tpu.memory_space<vmem>>, %arg3: memref<1x6xf32, #tpu.memory_space<vmem>>, %arg4: memref<16x6xf32, #tpu.memory_space<vmem>>) attributes {dimension_semantics = [#tpu.dimension_semantics<parallel>], iteration_bounds = array<i64: 1>, scalar_prefetch = 0 : i64, scratch_operands = 0 : i64, tpu.core_type = #tpu.core_type<tc>, window_params = [{transform_indices = @transform_0, window_bounds = array<i64: 16, 32>}, {pipeline_mode = #tpu.pipeline_mode<synchronous>, transform_indices = @transform_1, window_bounds = array<i64: 6, 32>}, {pipeline_mode = #tpu.pipeline_mode<synchronous>, transform_indices = @transform_2, window_bounds = array<i64: 1, 6>}, {transform_indices = @transform_3, window_bounds = array<i64: 16, 6>}]} {
    %c0 = arith.constant 0 : index
    %c0_0 = arith.constant 0 : index
    %0 = vector.load %arg1[%c0, %c0_0] : memref<16x32xf32, #tpu.memory_space<vmem>>, vector<16x32xf32>
    %c0_1 = arith.constant 0 : index
    %c0_2 = arith.constant 0 : index
    %1 = vector.load %arg2[%c0_1, %c0_2] : memref<6x32xf32, #tpu.memory_space<vmem>>, vector<6x32xf32>
    %cst = arith.constant dense<0.000000e+00> : vector<16x6xf32>
    %2 = tpu.matmul %0, %1, %cst {dimension_numbers = #tpu.dot_dimension_numbers<[1], [1], [0], [0], [0, 0, 1, 0], [], []>} : vector<16x32xf32>, vector<6x32xf32>, vector<16x6xf32> -> vector<16x6xf32>
    %c0_3 = arith.constant 0 : index
    %c0_4 = arith.constant 0 : index
    %3 = vector.load %arg3[%c0_3, %c0_4] : memref<1x6xf32, #tpu.memory_space<vmem>>, vector<1x6xf32>
    %4 = vector.broadcast %3 : vector<1x6xf32> to vector<16x6xf32>
    %5 = arith.addf %2, %4 : vector<16x6xf32>
    %c0_5 = arith.constant 0 : index
    %c0_6 = arith.constant 0 : index
    %6 = vector.load %arg4[%c0_5, %c0_6] : memref<16x6xf32, #tpu.memory_space<vmem>>, vector<16x6xf32>
    tpu.vector_store %arg4[%c0_5, %c0_6], %5 {strides = array<i32>} : memref<16x6xf32, #tpu.memory_space<vmem>>, vector<16x6xf32>,
    return
  }
  func.func @transform_0(%arg0: i32) -> (i32, i32) {
    %c0_i32 = arith.constant 0 : i32
    %c0_i32_0 = arith.constant 0 : i32
    return %arg0, %c0_i32 : i32, i32
  }
  func.func @transform_1(%arg0: i32) -> (i32, i32) {
    %c0_i32 = arith.constant 0 : i32
    %c0_i32_0 = arith.constant 0 : i32
    %c0_i32_1 = arith.constant 0 : i32
    return %c0_i32, %c0_i32_0 : i32, i32
  }
  func.func @transform_2(%arg0: i32) -> (i32, i32) {
    %c0_i32 = arith.constant 0 : i32
    %c0_i32_0 = arith.constant 0 : i32
    %c0_i32_1 = arith.constant 0 : i32
    return %c0_i32, %c0_i32_0 : i32, i32
  }
  func.func @transform_3(%arg0: i32) -> (i32, i32) {
    %c0_i32 = arith.constant 0 : i32
    %c0_i32_0 = arith.constant 0 : i32
    return %arg0, %c0_i32 : i32, i32
  }
}

</mosaic_0001>

<bundles_post_ra>
// kernel: backbone_update.1
= control target key start
LH: loop header
LB: loop body
LE: loop exit
PB: predicated region body
PF: predicated region fallthrough
CT: control target
= control target key end

     0   :  { %8 = vsyncpa [#allocation3], 0  ;;  %s243_s0 = inlined_call_operand.hbm [shape: f32[16,32], index: 0, kind: input, shape index: {}]   ;;  %s244_s1 = inlined_call_operand.hbm [shape: f32[6,32], index: 1, kind: input, shape index: {}]   ;;  %s245_s2 = inlined_call_operand.vmem [shape: f32[1,6], index: 2, kind: input, shape index: {}]   ;;  %s246_s3 = inlined_call_operand.vmem [shape: f32[16,6], index: 3, kind: output, shape index: {}]  }
   0x1   :  { %9 = vsyncpa [#allocation5], 0  ;;  %s204_s12 = smov [#allocation2]  }
   0x2   :  { %s15_s13 = sshll.u32 %s204_s12, 4  ;;  %s16_s13 = int_to_ptr.vmem [resolvable:$true] %s15_s13 }
   0x3   :  { %s168_s14 = scalar_lea.vmem %s16_s13, 256  ;;  %p173_p1 = scmp.lt.s32.totalorder %s16_s13, %s16_s13 }
   0x4   :  { %p169_p0 = scmp.ne.s32.totalorder %s16_s13, %s168_s14  ;;  %p174_p2 = scmp.lt.s32.totalorder %s168_s14, %s168_s14 }
   0x6   :  { %p175_p3 = por %p174_p2, %p173_p1 }
   0x8   :  { %p176_p4 = pnand %p175_p3, %p169_p0 }
   0xa   :  { %179 = shalt.err (!%p176_p4)
}
   0xb   :  { %s205_s15 = smov 128   ;;  %s206_s16 = smov 8  }
   0xc   :  { %21 = dma.hbm_to_vmem [thread:$0]  %s243_s0, 256, %s16_s13, [#allocation3], %s205_s15, %s205_s15, %s206_s16  }
   0xd   :  { %s207_s19 = smov [#allocation4]  }
   0xe   :  { %s28_s20 = sshll.u32 %s207_s19, 4  ;;  %s29_s20 = int_to_ptr.vmem [resolvable:$true] %s28_s20 }
   0xf   :  { %s188_s21 = scalar_lea.vmem %s29_s20, 128  ;;  %p193_p6 = scmp.lt.s32.totalorder %s29_s20, %s29_s20 }
  0x10   :  { %p189_p5 = scmp.ne.s32.totalorder %s29_s20, %s188_s21  ;;  %p194_p7 = scmp.lt.s32.totalorder %s188_s21, %s188_s21 }
  0x12   :  { %p195_p8 = por %p194_p7, %p193_p6 }
  0x14   :  { %p196_p9 = pnand %p195_p8, %p189_p5 }
  0x16   :  { %199 = shalt.err (!%p196_p9)
}
  0x17   :  { %31 = dma.hbm_to_vmem [thread:$0]  %s244_s1, 128, %s29_s20, [#allocation5]  }
  0x18   :  { %200 = dma.done.wait [#allocation3], 256  }
  0x19   :  { %201 = vsyncadd [#allocation3], 4294967040 }
  0x1a   :  { %202 = dma.done.wait [#allocation5], 128  }
  0x1b   :  { %203 = vsyncadd [#allocation5], 4294967168  ;;  %vm50_vm0 = vcmask 261120   ;;  %v42_v0 = vld [vmem:[#allocation4] sm:$0x3f]  ;;  %v40_v1 = vld [vmem:[#allocation2] sm:$0xff] }
  0x1c   :  { %151 = vmatprep.subr.msk.mxu0 %vm50_vm0, %v42_v0  ;;  %153 = vmatprep.mubr.msk.f32.mxu0 %vm50_vm0, %v40_v1  ;;  %v41_v2 = vld [vmem:[#allocation2 + $0x8] sm:$0xff]  ;;  %v144_v3 = vld [vmem:[%s245_s2] ss:$0 sm:$0xff]  ;;  %vm135_vm1 = vcmask 48128  }
  0x1d   :  { %152 = vmatpush3.xpose.msk.msra.mxu0 %vm50_vm0, %v42_v0 }
  0x20   :  { %154 = vmatmul.mubr.msk.f32.vlgmr.msra.gmra.mxu0 %vm50_vm0, %v41_v2 }
  0xe0   :  { %v155_v4 = vpop.f32.mrf.mxu0 }
  0xe1   :  { %v132_v5 = vadd.f32 %v155_v4, %v144_v3 }
  0xe2   :  { %v126_v6 = vpop.f32.mrf.mxu0 }
  0xe3   :  { %137 = vst.msk [vmem:[%s246_s3 + $0x8] sm:$0xff] %vm135_vm1, %v132_v5  ;;  %v127_v7 = vadd.f32 %v144_v3, %v126_v6 }
  0xe5   :  { %136 = vst.msk [vmem:[%s246_s3] sm:$0xff] %vm135_vm1, %v127_v7 }
  0xe6   :  { %142 = vsyncpa [#allocation3], 1 }
  0xe7   :  { %143 = vsyncpa [#allocation5], 1 }

</bundles_post_ra>
